<compile_context>
chip_gen: v7x
topology: tpu7x:2x2x1
jax: 0.10.0
libtpu: 0.0.40
codegen_flags: <defaults>
</compile_context>

<pallas_src>
import functools

import jax
import jax.numpy as jnp
from jax.experimental import pallas as pl
from jax.experimental.pallas import tpu as pltpu


# 48 MiB scoped VMEM: headroom on v7x (64 MiB physical), well under v5e/v6e.
VMEM_LIMIT_BYTES = 48 * 1024 * 1024

# Preferred tile sizes (multiples of 256 for v6e/v7x MXU geometry, of 128 for v5e).
TILE_M = 512
TILE_N = 512
TILE_K = 1024
FULL_K_MAX = 2048   # use the whole reduction dim as one block when it is <= this


def _fit(dim, pref):
    """Largest tile <= pref (halving, >=128) that divides `dim`, else the full dim."""
    t = pref
    while t >= 128:
        if dim % t == 0:
            return t
        t //= 2
    return dim


def _fit_k(dim):
    """Reduction-dim block: whole dim when small (no accumulator pass), else tiled."""
    if dim <= FULL_K_MAX:
        return dim
    return _fit(dim, TILE_K)


def _act_epilogue(y, b, act):
    y = y + b
    if act == "gelu":
        # TODO(synk): HF "gelu" is exact erf GELU; tanh approximation used since
        # erf has no guaranteed Mosaic lowering.
        y = jax.nn.gelu(y, approximate=True)
    elif act == "tanh":
        y = jnp.tanh(y)
    return y


def _ln_finish(y, g, bt, eps):
    mu = jnp.mean(y, axis=-1, keepdims=True)
    var = jnp.mean(jnp.square(y - mu), axis=-1, keepdims=True)
    return (y - mu) * jax.lax.rsqrt(var + eps) * g + bt


# ---------------------------------------------------------------------------
# Tiled linear (+ optional fused activation)
# ---------------------------------------------------------------------------

def _linear_kernel_acc(x_ref, w_ref, b_ref, o_ref, acc_ref, *, act):
    @pl.when(pl.program_id(2) == 0)
    def _():
        acc_ref[...] = jnp.zeros_like(acc_ref)

    acc_ref[...] += jnp.dot(x_ref[...], w_ref[...],
                            preferred_element_type=jnp.float32)

    @pl.when(pl.program_id(2) == pl.num_programs(2) - 1)
    def _():
        o_ref[...] = _act_epilogue(acc_ref[...], b_ref[...], act).astype(o_ref.dtype)


def _linear_kernel_1k(x_ref, w_ref, b_ref, o_ref, *, act):
    y = jnp.dot(x_ref[...], w_ref[...], preferred_element_type=jnp.float32)
    o_ref[...] = _act_epilogue(y, b_ref[...], act).astype(o_ref.dtype)


def linear(x, w, b, act="none", out_dtype=jnp.bfloat16):
    """y = act(x @ w + b); x:(M,K) (cast to bf16), w:(K,N) bf16, b:(N,) f32."""
    M, K = x.shape
    K2, N = w.shape
    assert K == K2
    bm, bn, bk = _fit(M, TILE_M), _fit(N, TILE_N), _fit_k(K)
    gm, gn, gk = M // bm, N // bn, K // bk
    if gk == 1:
        kernel = functools.partial(_linear_kernel_1k, act=act)
        scratch = []
    else:
        kernel = functools.partial(_linear_kernel_acc, act=act)
        scratch = [pltpu.VMEM((bm, bn), jnp.float32)]
    return pl.pallas_call(
        kernel,
        grid=(gm, gn, gk),
        in_specs=[
            pl.BlockSpec((bm, bk), lambda i, j, k: (i, k)),
            pl.BlockSpec((bk, bn), lambda i, j, k: (k, j)),
            pl.BlockSpec((1, bn), lambda i, j, k: (0, j)),
        ],
        out_specs=pl.BlockSpec((bm, bn), lambda i, j, k: (i, j)),
        out_shape=jax.ShapeDtypeStruct((M, N), out_dtype),
        scratch_shapes=scratch,
        compiler_params=pltpu.CompilerParams(
            dimension_semantics=("parallel", "parallel", "arbitrary"),
            vmem_limit_bytes=VMEM_LIMIT_BYTES),
    )(x.astype(jnp.bfloat16), w, b.reshape(1, N))


# ---------------------------------------------------------------------------
# Tiled linear with fused (bias + residual + LayerNorm) epilogue
# ---------------------------------------------------------------------------

def _linear_ln_kernel_acc(x_ref, w_ref, b_ref, r_ref, g_ref, bt_ref, o_ref,
                          acc_ref, *, eps):
    @pl.when(pl.program_id(1) == 0)
    def _():
        acc_ref[...] = jnp.zeros_like(acc_ref)

    acc_ref[...] += jnp.dot(x_ref[...], w_ref[...],
                            preferred_element_type=jnp.float32)

    @pl.when(pl.program_id(1) == pl.num_programs(1) - 1)
    def _():
        y = acc_ref[...] + b_ref[...] + r_ref[...].astype(jnp.float32)
        o_ref[...] = _ln_finish(y, g_ref[...], bt_ref[...], eps).astype(o_ref.dtype)


def _linear_ln_kernel_1k(x_ref, w_ref, b_ref, r_ref, g_ref, bt_ref, o_ref, *, eps):
    y = jnp.dot(x_ref[...], w_ref[...], preferred_element_type=jnp.float32)
    y = y + b_ref[...] + r_ref[...].astype(jnp.float32)
    o_ref[...] = _ln_finish(y, g_ref[...], bt_ref[...], eps).astype(o_ref.dtype)


def linear_ln_res(x, w, b, res, gamma, beta, eps=1e-12):
    """LayerNorm((x @ w + b) + res); N (hidden) kept whole so LN reduces over lanes."""
    M, K = x.shape
    K2, N = w.shape
    assert K == K2
    bm, bk = _fit(M, TILE_M), _fit_k(K)
    gm, gk = M // bm, K // bk
    if gk == 1:
        kernel = functools.partial(_linear_ln_kernel_1k, eps=eps)
        scratch = []
    else:
        kernel = functools.partial(_linear_ln_kernel_acc, eps=eps)
        scratch = [pltpu.VMEM((bm, N), jnp.float32)]
    return pl.pallas_call(
        kernel,
        grid=(gm, gk),
        in_specs=[
            pl.BlockSpec((bm, bk), lambda i, k: (i, k)),
            pl.BlockSpec((bk, N), lambda i, k: (k, 0)),
            pl.BlockSpec((1, N), lambda i, k: (0, 0)),
            pl.BlockSpec((bm, N), lambda i, k: (i, 0)),
            pl.BlockSpec((1, N), lambda i, k: (0, 0)),
            pl.BlockSpec((1, N), lambda i, k: (0, 0)),
        ],
        out_specs=pl.BlockSpec((bm, N), lambda i, k: (i, 0)),
        out_shape=jax.ShapeDtypeStruct((M, N), jnp.bfloat16),
        scratch_shapes=scratch,
        compiler_params=pltpu.CompilerParams(
            dimension_semantics=("parallel", "arbitrary"),
            vmem_limit_bytes=VMEM_LIMIT_BYTES),
    )(x.astype(jnp.bfloat16), w, b.reshape(1, N), res.astype(jnp.bfloat16),
      gamma.reshape(1, N), beta.reshape(1, N))


# ---------------------------------------------------------------------------
# Row-tiled LayerNorm (embeddings)
# ---------------------------------------------------------------------------

def _ln_kernel(x_ref, g_ref, b_ref, o_ref, *, eps):
    x = x_ref[...].astype(jnp.float32)
    o_ref[...] = _ln_finish(x, g_ref[...], b_ref[...], eps).astype(o_ref.dtype)


def layernorm(x, gamma, beta, eps=1e-12):
    M, H = x.shape
    bm = _fit(M, TILE_M)
    return pl.pallas_call(
        functools.partial(_ln_kernel, eps=eps),
        grid=(M // bm,),
        in_specs=[
            pl.BlockSpec((bm, H), lambda i: (i, 0)),
            pl.BlockSpec((1, H), lambda i: (0, 0)),
            pl.BlockSpec((1, H), lambda i: (0, 0)),
        ],
        out_specs=pl.BlockSpec((bm, H), lambda i: (i, 0)),
        out_shape=jax.ShapeDtypeStruct((M, H), jnp.bfloat16),
        compiler_params=pltpu.CompilerParams(
            dimension_semantics=("parallel",),
            vmem_limit_bytes=VMEM_LIMIT_BYTES),
    )(x, gamma.reshape(1, H), beta.reshape(1, H))


# ---------------------------------------------------------------------------
# Self-attention: one batch element per grid step, all heads in-kernel.
# qkv stays token-major (B, S, 3H): no split-heads transposes, lane-dense
# (1, S, H) output block, per-head static unroll, mask broadcast via BlockSpec.
# ---------------------------------------------------------------------------

def _attn_kernel(qkv_ref, m_ref, o_ref, *, nh, hd, scale):
    qkv = qkv_ref[0]                       # (S, 3H) bf16
    mask = m_ref[0]                        # (1, S)  f32 additive mask
    H = nh * hd
    parts = []
    for h in range(nh):                    # static unroll over heads
        # Fold the 1/sqrt(hd) scale into q (cheap (S,hd) multiply, stays bf16).
        q = qkv[:, h * hd:(h + 1) * hd] * scale
        k = qkv[:, H + h * hd:H + (h + 1) * hd]
        v = qkv[:, 2 * H + h * hd:2 * H + (h + 1) * hd]
        # q @ k^T without materializing a transpose.
        s = jax.lax.dot_general(q, k, (((1,), (1,)), ((), ())),
                                preferred_element_type=jnp.float32)
        s = s + mask
        s = s - jnp.max(s, axis=-1, keepdims=True)
        p = jnp.exp(s)
        p = p * pl.reciprocal(jnp.sum(p, axis=-1, keepdims=True), approx=True)
        ctx = jnp.dot(p.astype(v.dtype), v, preferred_element_type=jnp.float32)
        parts.append(ctx)
    o_ref[0] = jnp.concatenate(parts, axis=-1).astype(o_ref.dtype)


def attention(qkv, add_mask, nh, hd):
    """qkv:(B,S,3H) bf16 fused projections; add_mask:(B,1,S) f32 additive mask."""
    B, S, threeH = qkv.shape
    H = nh * hd
    assert threeH == 3 * H
    scale = 1.0 / float(hd) ** 0.5
    return pl.pallas_call(
        functools.partial(_attn_kernel, nh=nh, hd=hd, scale=scale),
        grid=(B,),
        in_specs=[
            pl.BlockSpec((1, S, threeH), lambda b: (b, 0, 0)),
            pl.BlockSpec((1, 1, S), lambda b: (b, 0, 0)),   # broadcast over heads
        ],
        out_specs=pl.BlockSpec((1, S, H), lambda b: (b, 0, 0)),
        out_shape=jax.ShapeDtypeStruct((B, S, H), jnp.bfloat16),
        compiler_params=pltpu.CompilerParams(
            dimension_semantics=("parallel",),
            vmem_limit_bytes=VMEM_LIMIT_BYTES),
    )(qkv, add_mask)


# ---------------------------------------------------------------------------
# Parameters (deterministic synthetic init, BERT-style std=0.02)
# ---------------------------------------------------------------------------

def init_params(key, *, vocab_size, max_pos, type_vocab, hidden, num_layers,
                num_heads, intermediate, num_classes):
    std = 0.02

    def nxt():
        nonlocal key
        key, sub = jax.random.split(key)
        return sub

    def dense(fan_in, fan_out):
        w = (std * jax.random.normal(nxt(), (fan_in, fan_out), jnp.float32))
        return w.astype(jnp.bfloat16), jnp.zeros((fan_out,), jnp.float32)

    p = {
        "num_heads": num_heads,
        "word_emb": std * jax.random.normal(nxt(), (vocab_size, hidden), jnp.float32),
        "pos_emb":  std * jax.random.normal(nxt(), (max_pos, hidden), jnp.float32),
        "type_emb": std * jax.random.normal(nxt(), (type_vocab, hidden), jnp.float32),
        "emb_ln_g": jnp.ones((hidden,), jnp.float32),
        "emb_ln_b": jnp.zeros((hidden,), jnp.float32),
        "layers": [],
    }
    for _ in range(num_layers):
        qkv_w, qkv_b = dense(hidden, 3 * hidden)        # fused Q|K|V projection
        ao_w, ao_b = dense(hidden, hidden)
        fi_w, fi_b = dense(hidden, intermediate)
        fo_w, fo_b = dense(intermediate, hidden)
        p["layers"].append({
            "qkv_w": qkv_w, "qkv_b": qkv_b,
            "ao_w": ao_w, "ao_b": ao_b,
            "ln1_g": jnp.ones((hidden,), jnp.float32),
            "ln1_b": jnp.zeros((hidden,), jnp.float32),
            "fi_w": fi_w, "fi_b": fi_b, "fo_w": fo_w, "fo_b": fo_b,
            "ln2_g": jnp.ones((hidden,), jnp.float32),
            "ln2_b": jnp.zeros((hidden,), jnp.float32),
        })
    p["pool_w"], p["pool_b"] = dense(hidden, hidden)
    p["fc_w"], p["fc_b"] = dense(hidden, num_classes)
    return p


# ---------------------------------------------------------------------------
# Model forward  (== self.fc(self.bert(x, attention_mask=mask).pooler_output))
# ---------------------------------------------------------------------------

def model_forward(params, input_ids, attention_mask):
    B, S = input_ids.shape
    H = params["word_emb"].shape[1]
    nh = params["num_heads"]
    hd = H // nh

    # Embeddings (gathers are glue; LN is a Pallas kernel). token_type_ids = 0.
    emb = (params["word_emb"][input_ids]
           + params["pos_emb"][None, :S, :]
           + params["type_emb"][0][None, None, :])
    x = layernorm(emb.reshape(B * S, H), params["emb_ln_g"], params["emb_ln_b"])

    # HF-style extended additive attention mask, kept at (B,1,S); the per-head
    # broadcast happens via BlockSpec addressing inside the attention kernel.
    add_mask = ((1.0 - attention_mask.astype(jnp.float32)) * -1e9).reshape(B, 1, S)

    for lyr in params["layers"]:
        # --- self attention (fused QKV projection, fused residual+LN epilogue) ---
        qkv = linear(x, lyr["qkv_w"], lyr["qkv_b"])                # (B*S, 3H) bf16
        ctx = attention(qkv.reshape(B, S, 3 * H), add_mask, nh, hd)
        x = linear_ln_res(ctx.reshape(B * S, H), lyr["ao_w"], lyr["ao_b"],
                          x, lyr["ln1_g"], lyr["ln1_b"])
        # --- feed forward ---
        h = linear(x, lyr["fi_w"], lyr["fi_b"], act="gelu")
        x = linear_ln_res(h, lyr["fo_w"], lyr["fo_b"],
                          x, lyr["ln2_g"], lyr["ln2_b"])

    # Pooler: tanh(dense(hidden_states[:, 0])); then classification head.
    cls = x.reshape(B, S, H)[:, 0, :]
    pooled = linear(cls, params["pool_w"], params["pool_b"], act="tanh")
    logits = linear(pooled, params["fc_w"], params["fc_b"], out_dtype=jnp.float32)
    return logits


# ---------------------------------------------------------------------------

if __name__ == "__main__":
    B, S = 2, 8
    hidden, num_layers, num_heads, intermediate = 32, 2, 2, 64
    vocab_size, max_pos, type_vocab, num_classes = 100, 64, 2, 3

    key = jax.random.PRNGKey(0)
    pkey, ikey = jax.random.split(key)
    params = init_params(pkey, vocab_size=vocab_size, max_pos=max_pos,
                         type_vocab=type_vocab, hidden=hidden,
                         num_layers=num_layers, num_heads=num_heads,
                         intermediate=intermediate, num_classes=num_classes)

    input_ids = jax.random.randint(ikey, (B, S), 0, vocab_size, dtype=jnp.int32)
    attention_mask = jnp.ones((B, S), jnp.float32).at[1, 6:].set(0.0)  # pad last 2 of seq 1

    logits = model_forward(params, input_ids, attention_mask)
    jax.block_until_ready(logits)
    assert logits.shape == (B, num_classes)
    assert bool(jnp.all(jnp.isfinite(logits)))
    print("KERNEL_OK")
</pallas_src>

<mosaic_0001>
module attributes {stable_mosaic.version = 11 : i64} {
  func.func @_ln_kernel(%arg0: i32, %arg1: memref<16x32xf32, #tpu.memory_space<vmem>>, %arg2: memref<1x32xf32, #tpu.memory_space<vmem>>, %arg3: memref<1x32xf32, #tpu.memory_space<vmem>>, %arg4: memref<16x32xbf16, #tpu.memory_space<vmem>>) attributes {dimension_semantics = [#tpu.dimension_semantics<parallel>], iteration_bounds = array<i64: 1>, scalar_prefetch = 0 : i64, scratch_operands = 0 : i64, tpu.core_type = #tpu.core_type<tc>, window_params = [{transform_indices = @transform_0, window_bounds = array<i64: 16, 32>}, {pipeline_mode = #tpu.pipeline_mode<synchronous>, transform_indices = @transform_1, window_bounds = array<i64: 1, 32>}, {pipeline_mode = #tpu.pipeline_mode<synchronous>, transform_indices = @transform_2, window_bounds = array<i64: 1, 32>}, {transform_indices = @transform_3, window_bounds = array<i64: 16, 32>}]} {
    %c0 = arith.constant 0 : index
    %c0_0 = arith.constant 0 : index
    %0 = vector.load %arg1[%c0, %c0_0] : memref<16x32xf32, #tpu.memory_space<vmem>>, vector<16x32xf32>
    %c0_1 = arith.constant 0 : index
    %c0_2 = arith.constant 0 : index
    %1 = vector.load %arg2[%c0_1, %c0_2] : memref<1x32xf32, #tpu.memory_space<vmem>>, vector<1x32xf32>
    %c0_3 = arith.constant 0 : index
    %c0_4 = arith.constant 0 : index
    %2 = vector.load %arg3[%c0_3, %c0_4] : memref<1x32xf32, #tpu.memory_space<vmem>>, vector<1x32xf32>
    %cst = arith.constant dense<0.000000e+00> : vector<16xf32>
    %3 = vector.multi_reduction <add>, %0, %cst [1] : vector<16x32xf32> to vector<16xf32>
    %4 = vector.shape_cast %3 : vector<16xf32> to vector<16x1xf32>
    %cst_5 = arith.constant 3.200000e+01 : f32
    %5 = vector.broadcast %cst_5 : f32 to vector<16x1xf32>
    %6 = arith.divf %4, %5 : vector<16x1xf32>
    %7 = vector.broadcast %6 : vector<16x1xf32> to vector<16x32xf32>
    %8 = arith.subf %0, %7 : vector<16x32xf32>
    %9 = arith.mulf %8, %8 : vector<16x32xf32>
    %cst_6 = arith.constant dense<0.000000e+00> : vector<16xf32>
    %10 = vector.multi_reduction <add>, %9, %cst_6 [1] : vector<16x32xf32> to vector<16xf32>
    %11 = vector.shape_cast %10 : vector<16xf32> to vector<16x1xf32>
    %cst_7 = arith.constant 3.200000e+01 : f32
    %12 = vector.broadcast %cst_7 : f32 to vector<16x1xf32>
    %13 = arith.divf %11, %12 : vector<16x1xf32>
    %14 = vector.broadcast %6 : vector<16x1xf32> to vector<16x32xf32>
    %15 = arith.subf %0, %14 : vector<16x32xf32>
    %cst_8 = arith.constant 9.99999996E-13 : f32
    %16 = vector.broadcast %cst_8 : f32 to vector<16x1xf32>
    %17 = arith.addf %13, %16 : vector<16x1xf32>
    %18 = math.rsqrt %17 : vector<16x1xf32>
    %19 = vector.broadcast %18 : vector<16x1xf32> to vector<16x32xf32>
    %20 = arith.mulf %15, %19 : vector<16x32xf32>
    %21 = vector.broadcast %1 : vector<1x32xf32> to vector<16x32xf32>
    %22 = arith.mulf %20, %21 : vector<16x32xf32>
    %23 = vector.broadcast %2 : vector<1x32xf32> to vector<16x32xf32>
    %24 = arith.addf %22, %23 : vector<16x32xf32>
    %25 = arith.truncf %24 : vector<16x32xf32> to vector<16x32xbf16>
    %c0_9 = arith.constant 0 : index
    %c0_10 = arith.constant 0 : index
    %26 = vector.load %arg4[%c0_9, %c0_10] : memref<16x32xbf16, #tpu.memory_space<vmem>>, vector<16x32xbf16>
    tpu.vector_store %arg4[%c0_9, %c0_10], %25 {strides = array<i32>} : memref<16x32xbf16, #tpu.memory_space<vmem>>, vector<16x32xbf16>,
    return
  }
  func.func @transform_0(%arg0: i32) -> (i32, i32) {
    %c0_i32 = arith.constant 0 : i32
    %c0_i32_0 = arith.constant 0 : i32
    return %arg0, %c0_i32 : i32, i32
  }
  func.func @transform_1(%arg0: i32) -> (i32, i32) {
    %c0_i32 = arith.constant 0 : i32
    %c0_i32_0 = arith.constant 0 : i32
    %c0_i32_1 = arith.constant 0 : i32
    return %c0_i32, %c0_i32_0 : i32, i32
  }
  func.func @transform_2(%arg0: i32) -> (i32, i32) {
    %c0_i32 = arith.constant 0 : i32
    %c0_i32_0 = arith.constant 0 : i32
    %c0_i32_1 = arith.constant 0 : i32
    return %c0_i32, %c0_i32_0 : i32, i32
  }
  func.func @transform_3(%arg0: i32) -> (i32, i32) {
    %c0_i32 = arith.constant 0 : i32
    %c0_i32_0 = arith.constant 0 : i32
    return %arg0, %c0_i32 : i32, i32
  }
}

</mosaic_0001>

<bundles_post_ra>
// kernel: tpu_custom_call.1
= control target key start
LH: loop header
LB: loop body
LE: loop exit
PB: predicated region body
PF: predicated region fallthrough
CT: control target
= control target key end

     0   :  { %8 = vsyncpa [#allocation3], 0  ;;  %s229_s0 = inlined_call_operand.hbm [shape: f32[16,32], index: 0, kind: input, shape index: {}]   ;;  %s230_s1 = inlined_call_operand.vmem [shape: f32[1,32], index: 1, kind: input, shape index: {}]   ;;  %s231_s2 = inlined_call_operand.vmem [shape: f32[1,32], index: 2, kind: input, shape index: {}]   ;;  %s232_s3 = inlined_call_operand.hbm [shape: bf16[16,32], index: 3, kind: output, shape index: {}]  }
   0x1   :  { %9 = vsyncpa [#allocation4], 0  ;;  %s169_s12 = smov [#allocation2]   ;;  %s121_s16 = scalar_lea.hbm %s229_s0, 256 }
   0x2   :  { %s15_s13 = sshll.u32 %s169_s12, 4  ;;  %p122_p0 = scmp.ne.s32.totalorder %s229_s0, %s121_s16  ;;  %s16_s13 = int_to_ptr.vmem [resolvable:$true] %s15_s13 }
   0x3   :  { %p125_p1 = scmp.lt.u32.totalorder %s121_s16, %s229_s0 }
   0x5   :  { %p127_p2 = pnand %p125_p1, %p122_p0 }
   0x7   :  { %130 = shalt.err (!%p127_p2)
}
   0x8   :  { %s131_s21 = scalar_lea.vmem %s16_s13, 256  ;;  %p136_p4 = scmp.lt.s32.totalorder %s16_s13, %s16_s13 }
   0x9   :  { %p132_p3 = scmp.ne.s32.totalorder %s16_s13, %s131_s21  ;;  %p137_p5 = scmp.lt.s32.totalorder %s131_s21, %s131_s21 }
   0xb   :  { %p138_p6 = por %p137_p5, %p136_p4 }
   0xd   :  { %p139_p7 = pnand %p138_p6, %p132_p3 }
   0xf   :  { %142 = shalt.err (!%p139_p7)
}
  0x10   :  { %s170_s22 = smov 128   ;;  %s171_s23 = smov 8  }
  0x11   :  { %21 = dma.hbm_to_vmem [thread:$0]  %s229_s0, 256, %s16_s13, [#allocation3], %s170_s22, %s170_s22, %s171_s23  }
  0x12   :  { %165 = dma.done.wait [#allocation3], 256  }
  0x13   :  { %166 = vsyncadd [#allocation3], 4294967040  ;;  %vm33_vm0 = vcmask 261120   ;;  %v29_v0 = vld [vmem:[#allocation2] sm:$0xff]  ;;  %v30_v1 = vld [vmem:[#allocation2 + $0x8] sm:$0xff]  ;;  %vm85_vm1 = vcmask 257024  }
  0x14   :  { %v34_v2 = vsel %vm33_vm0, %v29_v0, 0.0  ;;  %v37_v3 = vsel %vm33_vm0, %v30_v1, 0.0  ;;  %v105_v21 = vld [vmem:[%s230_s1] ss:$0 sm:$0xff]  ;;  %s172_s29 = smov [#allocation5]  }
  0x15   :  { %35 = vadd.xlane.f32.xlu0 %v34_v2  ;;  %v106_v23 = vld [vmem:[%s231_s2] ss:$0 sm:$0xff]  ;;  %s93_s30 = sshll.u32 %s172_s29, 4  ;;  %s94_s30 = int_to_ptr.vmem [resolvable:$true] %s93_s30 }
  0x16   :  { %s143_s1 = scalar_lea.vmem %s94_s30, 128  ;;  %p148_p9 = scmp.lt.s32.totalorder %s94_s30, %s94_s30 }
  0x17   :  { %p144_p8 = scmp.ne.s32.totalorder %s94_s30, %s143_s1  ;;  %p149_p10 = scmp.lt.s32.totalorder %s143_s1, %s143_s1 }
  0x19   :  { %38 = vadd.xlane.f32.xlu0 %v37_v3  ;;  %p150_p11 = por %p149_p10, %p148_p9 }
  0x1b   :  { %p151_p12 = pnand %p150_p11, %p144_p8 }
  0xa2   :  { %v36_v4 = vpop.xlane.xlu0 %35 }
  0xa3   :  { %v41_v5 = vmul.f32 0.03125, %v36_v4 }
  0xa5   :  { %v43_v6 = vsub.f32 %v29_v0, %v41_v5 }
  0xa6   :  { %v39_v7 = vpop.xlane.xlu0 %38 }
  0xa7   :  { %v42_v8 = vmul.f32 0.03125, %v39_v7  ;;  %v45_v9 = vmul.f32 %v43_v6, %v43_v6 }
  0xa9   :  { %v44_v10 = vsub.f32 %v30_v1, %v42_v8  ;;  %v47_v11 = vsel %vm33_vm0, %v45_v9, 0.0 }
  0xaa   :  { %48 = vadd.xlane.f32.xlu1 %v47_v11 }
  0xab   :  { %v46_v12 = vmul.f32 %v44_v10, %v44_v10 }
  0xad   :  { %v50_v13 = vsel %vm33_vm0, %v46_v12, 0.0 }
  0xae   :  { %51 = vadd.xlane.f32.xlu1 %v50_v13 }
 0x137   :  { %v49_v14 = vpop.xlane.xlu1 %48 }
 0x138   :  { %v53_v15 = vmul.f32 0.03125, %v49_v14 }
 0x13a   :  { %v55_v16 = vadd.f32 1e-12, %v53_v15 }
 0x13b   :  { %v52_v17 = vpop.xlane.xlu1 %51 }
 0x13c   :  { %117 = vrsqrt.f32 %v55_v16  ;;  %v54_v18 = vmul.f32 0.03125, %v52_v17 }
 0x13e   :  { %v56_v19 = vadd.f32 1e-12, %v54_v18 }
 0x140   :  { %119 = vrsqrt.f32 %v56_v19 }
 0x146   :  { %v118_v20 = vpop.eup %117 }
 0x147   :  { %v59_v22 = vmul.f32 %v118_v20, %v43_v6 }
 0x149   :  { %v67_v24 = vmul.f32 %v105_v21, %v59_v22 }
 0x14a   :  { %v120_v25 = vpop.eup %119 }
 0x14b   :  { %v60_v26 = vmul.f32 %v120_v25, %v44_v10  ;;  %v75_v27 = vadd.f32 %v106_v23, %v67_v24 }
 0x14d   :  { %v68_v28 = vmul.f32 %v105_v21, %v60_v26  ;;  %v109_v29 = vpack.c.bf16 %v75_v27, %v75_v27 }
 0x14f   :  { %v76_v30 = vadd.f32 %v106_v23, %v68_v28  ;;  %86 = vst.msk [vmem:[#allocation5] sm:$0xf] %vm85_vm1, %v109_v29 }
 0x151   :  { %v110_v31 = vpack.c.bf16 %v76_v30, %v76_v30 }
 0x153   :  { %87 = vst.msk [vmem:[#allocation5 + $0x4] sm:$0xf] %vm85_vm1, %v110_v31 }
 0x154   :  { %154 = shalt.err (!%p151_p12)
}
 0x155   :  { %s155_s5 = scalar_lea.hbm %s232_s3, 128 }
 0x156   :  { %p156_p13 = scmp.ne.s32.totalorder %s232_s3, %s155_s5  ;;  %p159_p0 = scmp.lt.u32.totalorder %s155_s5, %s232_s3 }
 0x158   :  { %p161_p1 = pnand %p159_p0, %p156_p13 }
 0x15a   :  { %164 = shalt.err (!%p161_p1)
}
 0x15b   :  { %s173_s10 = smov 64   ;;  %s174_s11 = smov 4  }
 0x15c   :  { %99 = dma.vmem_to_hbm [thread:$0]  %s94_s30, 128, %s232_s3, [#allocation4], %s173_s10, %s173_s10, %s174_s11  }
 0x15d   :  { %167 = dma.done.wait [#allocation4], 128  }
 0x15e   :  { %168 = vsyncadd [#allocation4], 4294967168 }
 0x15f   :  { %103 = vsyncpa [#allocation3], 1 }
 0x160   :  { %104 = vsyncpa [#allocation4], 1 }

</bundles_post_ra>
